<compile_context>
chip_gen: v5e
topology: v5e:2x2
jax: 0.10.0
libtpu: 0.0.40
codegen_flags: <defaults>
</compile_context>

<pallas_src>
import functools

import jax
import jax.numpy as jnp
from jax.experimental import pallas as pl
from jax.experimental.pallas import tpu as pltpu


def _round_up(x, m):
    return (x + m - 1) // m * m


# ---------------------------------------------------------------------------
# Host-side parameter folding (tiny einsums, done once).
# ---------------------------------------------------------------------------
def _fold_params(params, cp, compute_dtype):
    """Fold (module_lr, module_hr, module_combined) into per-tap weights.

    Returns:
      w_all : (9, C_OUT, cp)  tap-major (tap t = (dy+1)*3 + (dx+1)); within a
              tap the cp columns are [lr channels | hr channels | zero pad].
      b_all : (C_OUT, 1) float32 folded bias (added in-kernel in f32).
    """
    f32 = jnp.float32
    w_lr = params["w_lr"].astype(f32)            # (3,3,Ci_lr,Co_lr)
    b_lr = params["b_lr"].astype(f32)
    w_hr = params.get("w_hr")
    b_hr = params.get("b_hr")
    w_comb = params.get("w_comb")
    b_comb = params.get("b_comb")
    has_hr = w_hr is not None
    if has_hr:
        w_hr = w_hr.astype(f32)
        b_hr = b_hr.astype(f32)

    ci_lr, co_lr = w_lr.shape[-2], w_lr.shape[-1]
    ci_hr = w_hr.shape[-2] if has_hr else 0
    co_hr = w_hr.shape[-1] if has_hr else 0

    if w_comb is not None:
        w_comb = w_comb.astype(f32)
        a_lr = w_comb[:co_lr]                                    # (Co_lr, C_OUT)
        a_hr = w_comb[co_lr:] if has_hr else None
        b_total = b_comb.astype(f32) + b_lr @ a_lr
        if has_hr:
            b_total = b_total + b_hr @ a_hr
    else:
        eye = jnp.eye(co_lr + co_hr, dtype=f32)
        a_lr = eye[:co_lr]
        a_hr = eye[co_lr:] if has_hr else None
        b_total = jnp.concatenate([b_lr, b_hr]) if has_hr else b_lr

    c_out = a_lr.shape[-1]
    # Fold the 1x1 projection into every 3x3 tap; transpose each tap to
    # (C_OUT, Cin) — the channels-as-rows orientation of the kernel matmuls.
    wt_lr = jnp.einsum("hwio,oc->hwci", w_lr, a_lr)              # (3,3,C_OUT,Ci_lr)
    wt_hr = jnp.einsum("hwio,oc->hwci", w_hr, a_hr) if has_hr else None

    ci_tot = ci_lr + ci_hr
    taps = []
    for t in range(9):
        ky, kx = divmod(t, 3)
        cols = [wt_lr[ky, kx]]
        if has_hr:
            cols.append(wt_hr[ky, kx])
        if cp > ci_tot:
            cols.append(jnp.zeros((c_out, cp - ci_tot), f32))
        taps.append(jnp.concatenate(cols, axis=1))               # (C_OUT, cp)
    w_all = jnp.stack(taps, axis=0).astype(compute_dtype)        # (9, C_OUT, cp)
    return w_all, b_total.reshape(c_out, 1).astype(f32)


# ---------------------------------------------------------------------------
# Pallas kernel: one (batch, row-block) tile per grid step.
# ---------------------------------------------------------------------------
def _fused_input_kernel(*refs, W, TR, CS, HALO, ci_lr, ci_hr, cp, c_out,
                        has_hr, nrb):
    """Refs: x_lr (1,Ci_lr,HW) [, x_hr (1,Ci_hr,HW)], w (9,C_OUT,cp),
             b (C_OUT,1) f32, out (1,C_OUT,TR*W), scratch pk (cp, 2*CS+TR*W).

    The scratch holds the channel-packed, row-halo'd tile of the current row
    block: image row (base + q) lives at lanes [CS + q*W, CS + (q+1)*W) for
    q in [-1, TR]; the halo rows (q = -1, TR) are zeros at the image border.
    """
    if has_hr:
        x_lr_ref, x_hr_ref, w_ref, b_ref, o_ref, pk_ref = refs
    else:
        x_lr_ref, w_ref, b_ref, o_ref, pk_ref = refs
        x_hr_ref = None

    cd = pk_ref.dtype
    TRW = TR * W
    TOTL = 2 * CS + TRW
    ci_tot = ci_lr + ci_hr
    single = (nrb == 1)

    rb = pl.program_id(1)
    last_rb = pl.num_programs(1) - 1
    base = rb * TRW
    if TRW % 128 == 0:
        base = pl.multiple_of(base, 128)

    # ---- pack [lr | hr | zero pad] channels of the halo'd row block ----
    def center(ref):
        if single:
            return ref[0].astype(cd)                    # static, whole image
        return ref[0, :, pl.ds(base, TRW)].astype(cd)   # 128-aligned start

    pk_ref[0:ci_lr, CS:CS + TRW] = center(x_lr_ref)
    if has_hr:
        pk_ref[ci_lr:ci_tot, CS:CS + TRW] = center(x_hr_ref)
    if cp > ci_tot:
        # Keep the channel-pad rows zero (their weight columns are zero, but
        # never multiply uninitialized VMEM).
        pk_ref[ci_tot:cp, :] = jnp.zeros((cp - ci_tot, TOTL), cd)

    if single:
        pk_ref[0:ci_tot, CS - W:CS] = jnp.zeros((ci_tot, W), cd)
        pk_ref[0:ci_tot, CS + TRW:CS + TRW + W] = jnp.zeros((ci_tot, W), cd)
    else:
        @pl.when(rb > 0)
        def _copy_top_halo():
            start = pl.multiple_of(base - HALO, 128)
            row = x_lr_ref[0, :, pl.ds(start, HALO)][:, HALO - W:].astype(cd)
            pk_ref[0:ci_lr, CS - W:CS] = row
            if has_hr:
                row = x_hr_ref[0, :, pl.ds(start, HALO)][:, HALO - W:].astype(cd)
                pk_ref[ci_lr:ci_tot, CS - W:CS] = row

        @pl.when(rb == 0)
        def _zero_top_halo():
            pk_ref[0:ci_tot, CS - W:CS] = jnp.zeros((ci_tot, W), cd)

        @pl.when(rb < last_rb)
        def _copy_bottom_halo():
            start = pl.multiple_of(base + TRW, 128)
            row = x_lr_ref[0, :, pl.ds(start, HALO)][:, :W].astype(cd)
            pk_ref[0:ci_lr, CS + TRW:CS + TRW + W] = row
            if has_hr:
                row = x_hr_ref[0, :, pl.ds(start, HALO)][:, :W].astype(cd)
                pk_ref[ci_lr:ci_tot, CS + TRW:CS + TRW + W] = row

        @pl.when(rb == last_rb)
        def _zero_bottom_halo():
            pk_ref[0:ci_tot, CS + TRW:CS + TRW + W] = jnp.zeros((ci_tot, W), cd)

    # ---- 9 per-tap MXU dots, f32 accumulation (no im2col materialization) --
    x_all = pk_ref[...]                                          # (cp, TOTL)
    lane = jax.lax.broadcasted_iota(jnp.int32, (1, TOTL), 1)
    col = jnp.mod(lane - CS, W)                                  # source col
    xm1 = jnp.where(col < W - 1, x_all, 0)                       # dx == -1 taps
    xp1 = jnp.where(col > 0, x_all, 0)                           # dx == +1 taps

    acc = jnp.zeros((c_out, TRW), jnp.float32)
    t = 0
    for dy in (-1, 0, 1):
        for dx in (-1, 0, 1):
            src = xm1 if dx == -1 else (xp1 if dx == 1 else x_all)
            off = CS + dy * W + dx                               # static window
            win = src[:, off:off + TRW]                          # (cp, TRW)
            acc = acc + jnp.dot(w_ref[t], win,
                                preferred_element_type=jnp.float32)
            t += 1

    out = acc + b_ref[...]                                       # f32 bias
    o_ref[0] = out.astype(o_ref.dtype)


# ---------------------------------------------------------------------------
# Forward wrapper (NCHW in / NCHW out, mirroring the PyTorch module).
# ---------------------------------------------------------------------------
def _pick_row_block(H, W, row_block, target_lanes=512):
    if row_block is not None:
        assert H % row_block == 0, "row_block must divide H"
        assert (row_block * W) % 128 == 0 or row_block == H, (
            "row_block*W must be a multiple of 128 (lane-dense output)")
        return row_block
    HW = H * W
    if HW % 128 != 0:
        return H   # fallback: whole image per step (masked lane stores)
    want = min(target_lanes, HW)
    for tr in range(1, H + 1):
        if H % tr == 0 and (tr * W) % 128 == 0 and tr * W >= want:
            return tr
    return H


def input_module_forward(params, input_lr_nchw, input_hr_nchw=None, *,
                         compute_dtype=None, out_dtype=None, row_block=None):
    has_hr = params.get("w_hr") is not None
    N, ci_lr, H, W = input_lr_nchw.shape
    HW = H * W
    ci_hr = input_hr_nchw.shape[1] if has_hr else 0
    ci_tot = ci_lr + ci_hr

    if compute_dtype is None:
        compute_dtype = input_lr_nchw.dtype
    if out_dtype is None:
        out_dtype = input_lr_nchw.dtype

    # Sublane packing multiple of the compute dtype (8 f32 / 16 bf16 / 32 i8).
    isz = jnp.dtype(compute_dtype).itemsize
    sub = {4: 8, 2: 16, 1: 32}[isz]
    cp = _round_up(ci_tot, sub)

    TR = _pick_row_block(H, W, row_block)
    HB = H // TR
    TRW = TR * W
    CS = max(128, _round_up(W + 1, 128))      # center start (aligned halo pad)
    HALO = _round_up(W, 128)                  # aligned halo-row load width
    TOTL = 2 * CS + TRW
    if HB > 1:
        assert TRW % 128 == 0 and TRW >= HALO

    w_all, b_all = _fold_params(params, cp, compute_dtype)
    c_out = w_all.shape[1]

    # Free reshape (NCHW contiguous): spatial flattened onto the lane axis.
    x_lr = input_lr_nchw.reshape(N, ci_lr, HW)
    args = [x_lr]
    in_specs = [pl.BlockSpec((1, ci_lr, HW), lambda n, rb: (n, 0, 0))]
    if has_hr:
        assert input_hr_nchw is not None
        assert input_hr_nchw.shape[0] == N and input_hr_nchw.shape[2:] == (H, W)
        x_hr = input_hr_nchw.reshape(N, ci_hr, HW)
        args.append(x_hr)
        in_specs.append(pl.BlockSpec((1, ci_hr, HW), lambda n, rb: (n, 0, 0)))
    args += [w_all, b_all]
    in_specs += [
        pl.BlockSpec((9, c_out, cp), lambda n, rb: (0, 0, 0)),
        pl.BlockSpec((c_out, 1), lambda n, rb: (0, 0)),
    ]

    kernel = functools.partial(
        _fused_input_kernel, W=W, TR=TR, CS=CS, HALO=HALO,
        ci_lr=ci_lr, ci_hr=ci_hr, cp=cp, c_out=c_out, has_hr=has_hr, nrb=HB)

    in_item = jnp.dtype(input_lr_nchw.dtype).itemsize
    out_item = jnp.dtype(out_dtype).itemsize
    in_bytes = ci_tot * N * HW * in_item
    out_bytes = N * c_out * HW * out_item
    w_bytes = w_all.size * w_all.dtype.itemsize + b_all.size * 4
    blk_in = ci_tot * HW * in_item              # resident per-image input
    blk_out = c_out * TRW * out_item
    scratch_bytes = cp * TOTL * isz
    live = (4 * cp * TOTL + 2 * c_out * TRW) * 4
    need = 2 * blk_in + 2 * blk_out + 2 * w_bytes + scratch_bytes + live
    vmem_limit = int(min(max(2 * need, 32 << 20), 64 << 20))

    out_flat = pl.pallas_call(
        kernel,
        out_shape=jax.ShapeDtypeStruct((N, c_out, HW), out_dtype),
        grid_spec=pltpu.PrefetchScalarGridSpec(
            num_scalar_prefetch=0,
            grid=(N, HB),
            in_specs=in_specs,
            out_specs=pl.BlockSpec((1, c_out, TRW), lambda n, rb: (n, 0, rb)),
            scratch_shapes=[pltpu.VMEM((cp, TOTL), compute_dtype)],
        ),
        compiler_params=pltpu.CompilerParams(
            dimension_semantics=("parallel", "parallel"),
            vmem_limit_bytes=vmem_limit),
        cost_estimate=pl.CostEstimate(
            flops=int(2 * N * c_out * 9 * cp * HW),
            transcendentals=0,
            bytes_accessed=int(in_bytes + out_bytes + w_bytes)),
    )(*args)
    # TODO(synk): for very large images, tile the resident input per row block
    # too (halo'd manual DMA from a pl.ANY ref) instead of keeping the whole
    # image per batch element in VMEM.
    return out_flat.reshape(N, c_out, H, W)


# ---------------------------------------------------------------------------
# Pure-JAX reference (unfused, full precision) for verification.
# ---------------------------------------------------------------------------
def _ref_forward(params, input_lr, input_hr=None):
    prec = jax.lax.Precision.HIGHEST

    def conv3x3(x, w, b):
        y = jax.lax.conv_general_dilated(
            x, w, window_strides=(1, 1), padding="SAME",
            dimension_numbers=("NCHW", "HWIO", "NCHW"), precision=prec)
        return y + b.reshape(1, -1, 1, 1)

    out = conv3x3(input_lr, params["w_lr"], params["b_lr"])
    if params.get("w_hr") is not None:
        out = jnp.concatenate(
            [out, conv3x3(input_hr, params["w_hr"], params["b_hr"])], axis=1)
    if params.get("w_comb") is not None:
        out = jnp.einsum("nchw,cd->ndhw", out, params["w_comb"], precision=prec)
        out = out + params["b_comb"].reshape(1, -1, 1, 1)
    return out


if __name__ == "__main__":
    key = jax.random.PRNGKey(0)
    k = jax.random.split(key, 8)

    N, H, W = 2, 16, 16
    C_LR_IN, C_HR_IN = 4, 3
    C_LR_OUT, C_HR_OUT = 8, 8
    C_COMB_IN = C_LR_OUT + C_HR_OUT
    C_OUT = 16

    params = {
        "w_lr":   jax.random.normal(k[0], (3, 3, C_LR_IN, C_LR_OUT), jnp.float32) * 0.1,
        "b_lr":   jax.random.normal(k[1], (C_LR_OUT,), jnp.float32) * 0.01,
        "w_hr":   jax.random.normal(k[2], (3, 3, C_HR_IN, C_HR_OUT), jnp.float32) * 0.1,
        "b_hr":   jax.random.normal(k[3], (C_HR_OUT,), jnp.float32) * 0.01,
        "w_comb": jax.random.normal(k[4], (C_COMB_IN, C_OUT), jnp.float32) * 0.1,
        "b_comb": jax.random.normal(k[5], (C_OUT,), jnp.float32) * 0.01,
    }

    input_lr = jax.random.normal(k[6], (N, C_LR_IN, H, W), jnp.float32)
    input_hr = jax.random.normal(k[7], (N, C_HR_IN, H, W), jnp.float32)

    ref = jax.block_until_ready(_ref_forward(params, input_lr, input_hr))

    # f32 path, auto row block (whole image per step for this small size).
    out_a = jax.block_until_ready(
        input_module_forward(params, input_lr, input_hr))
    assert out_a.shape == (N, C_OUT, H, W), out_a.shape
    err = float(jnp.max(jnp.abs(out_a - ref)))
    assert err < 1e-3, f"f32 auto-tile mismatch vs reference: {err}"

    # f32 path, explicit 8-row blocks (exercises the halo-row copy paths).
    out_b = jax.block_until_ready(
        input_module_forward(params, input_lr, input_hr, row_block=8))
    err = float(jnp.max(jnp.abs(out_b - ref)))
    assert err < 1e-3, f"f32 row-block mismatch vs reference: {err}"

    # bf16 compute path (f32 accumulation on the MXU), row-blocked.
    out_c = jax.block_until_ready(
        input_module_forward(params, input_lr, input_hr,
                             compute_dtype=jnp.bfloat16, row_block=8))
    err = float(jnp.max(jnp.abs(out_c - ref)))
    assert err < 5e-2, f"bf16 path mismatch vs reference: {err}"

    # LR-only configuration (module_hr = module_combined = None).
    params_lr = {"w_lr": params["w_lr"], "b_lr": params["b_lr"]}
    ref_lr = jax.block_until_ready(_ref_forward(params_lr, input_lr))
    out_d = jax.block_until_ready(
        input_module_forward(params_lr, input_lr, row_block=8))
    err = float(jnp.max(jnp.abs(out_d - ref_lr)))
    assert err < 1e-3, f"lr-only mismatch vs reference: {err}"

    print("KERNEL_OK")
</pallas_src>

<mosaic_0001>
module attributes {stable_mosaic.version = 11 : i64} {
  func.func @_fused_input_kernel(%arg0: i32, %arg1: i32, %arg2: memref<1x4x256xf32, #tpu.memory_space<vmem>>, %arg3: memref<1x3x256xf32, #tpu.memory_space<vmem>>, %arg4: memref<9x16x8xf32, #tpu.memory_space<vmem>>, %arg5: memref<16x1xf32, #tpu.memory_space<vmem>>, %arg6: memref<1x16x256xf32, #tpu.memory_space<vmem>>, %arg7: memref<8x512xf32, #tpu.memory_space<vmem>>) attributes {dimension_semantics = [#tpu.dimension_semantics<parallel>, #tpu.dimension_semantics<parallel>], iteration_bounds = array<i64: 2, 1>, scalar_prefetch = 0 : i64, scratch_operands = 1 : i64, tpu.core_type = #tpu.core_type<tc>, window_params = [{transform_indices = @transform_0, window_bounds = array<i64: 1, 4, 256>}, {transform_indices = @transform_1, window_bounds = array<i64: 1, 3, 256>}, {pipeline_mode = #tpu.pipeline_mode<synchronous>, transform_indices = @transform_2, window_bounds = array<i64: 9, 16, 8>}, {pipeline_mode = #tpu.pipeline_mode<synchronous>, transform_indices = @transform_3, window_bounds = array<i64: 16, 1>}, {transform_indices = @transform_4, window_bounds = array<i64: 1, 16, 256>}]} {
    %c0 = arith.constant 0 : index
    %c0_0 = arith.constant 0 : index
    %c0_1 = arith.constant 0 : index
    %0 = vector.load %arg2[%c0, %c0_0, %c0_1] : memref<1x4x256xf32, #tpu.memory_space<vmem>>, vector<1x4x256xf32>
    %1 = vector.shape_cast %0 : vector<1x4x256xf32> to vector<4x256xf32>
    %c0_2 = arith.constant 0 : index
    %c128 = arith.constant 128 : index
    %2 = vector.load %arg7[%c0_2, %c128] : memref<8x512xf32, #tpu.memory_space<vmem>>, vector<4x256xf32>
    tpu.vector_store %arg7[%c0_2, %c128], %1 {strides = array<i32>} : memref<8x512xf32, #tpu.memory_space<vmem>>, vector<4x256xf32>,
    %c0_3 = arith.constant 0 : index
    %c0_4 = arith.constant 0 : index
    %c0_5 = arith.constant 0 : index
    %3 = vector.load %arg3[%c0_3, %c0_4, %c0_5] : memref<1x3x256xf32, #tpu.memory_space<vmem>>, vector<1x3x256xf32>
    %4 = vector.shape_cast %3 : vector<1x3x256xf32> to vector<3x256xf32>
    %c4 = arith.constant 4 : index
    %c128_6 = arith.constant 128 : index
    %5 = vector.load %arg7[%c4, %c128_6] : memref<8x512xf32, #tpu.memory_space<vmem>>, vector<3x256xf32>
    tpu.vector_store %arg7[%c4, %c128_6], %4 {strides = array<i32>} : memref<8x512xf32, #tpu.memory_space<vmem>>, vector<3x256xf32>,
    %cst = arith.constant 0.000000e+00 : f32
    %6 = vector.broadcast %cst : f32 to vector<1x512xf32>
    %c7 = arith.constant 7 : index
    %c0_7 = arith.constant 0 : index
    %7 = vector.load %arg7[%c7, %c0_7] : memref<8x512xf32, #tpu.memory_space<vmem>>, vector<1x512xf32>
    tpu.vector_store %arg7[%c7, %c0_7], %6 {strides = array<i32>} : memref<8x512xf32, #tpu.memory_space<vmem>>, vector<1x512xf32>,
    %cst_8 = arith.constant 0.000000e+00 : f32
    %8 = vector.broadcast %cst_8 : f32 to vector<7x16xf32>
    %c0_9 = arith.constant 0 : index
    %c112 = arith.constant 112 : index
    %9 = vector.load %arg7[%c0_9, %c112] : memref<8x512xf32, #tpu.memory_space<vmem>>, vector<7x16xf32>
    tpu.vector_store %arg7[%c0_9, %c112], %8 {strides = array<i32>} : memref<8x512xf32, #tpu.memory_space<vmem>>, vector<7x16xf32>,
    %cst_10 = arith.constant 0.000000e+00 : f32
    %10 = vector.broadcast %cst_10 : f32 to vector<7x16xf32>
    %c0_11 = arith.constant 0 : index
    %c384 = arith.constant 384 : index
    %11 = vector.load %arg7[%c0_11, %c384] : memref<8x512xf32, #tpu.memory_space<vmem>>, vector<7x16xf32>
    tpu.vector_store %arg7[%c0_11, %c384], %10 {strides = array<i32>} : memref<8x512xf32, #tpu.memory_space<vmem>>, vector<7x16xf32>,
    %c0_12 = arith.constant 0 : index
    %c0_13 = arith.constant 0 : index
    %12 = vector.load %arg7[%c0_12, %c0_13] : memref<8x512xf32, #tpu.memory_space<vmem>>, vector<8x512xf32>
    %13 = tpu.iota {dimensions = array<i32: 1>} : vector<1x512xi32>
    %c128_i32 = arith.constant 128 : i32
    %14 = vector.broadcast %c128_i32 : i32 to vector<1x512xi32>
    %15 = arith.subi %13, %14 : vector<1x512xi32>
    %c16_i32 = arith.constant 16 : i32
    %c0_i32 = arith.constant 0 : i32
    %16 = arith.cmpi eq, %c16_i32, %c0_i32 : i32
    %c1_i32 = arith.constant 1 : i32
    %17 = arith.select %16, %c1_i32, %c16_i32 : i32
    %18 = vector.broadcast %17 : i32 to vector<1x512xi32>
    %19 = arith.remsi %15, %18 : vector<1x512xi32>
    %c0_i32_14 = arith.constant 0 : i32
    %20 = vector.broadcast %c0_i32_14 : i32 to vector<1x512xi32>
    %21 = arith.cmpi ne, %19, %20 : vector<1x512xi32>
    %c0_i32_15 = arith.constant 0 : i32
    %22 = vector.broadcast %c0_i32_15 : i32 to vector<1x512xi32>
    %23 = arith.cmpi slt, %19, %22 : vector<1x512xi32>
    %c0_i32_16 = arith.constant 0 : i32
    %24 = arith.cmpi slt, %17, %c0_i32_16 : i32
    %25 = vector.broadcast %24 : i1 to vector<1x512xi1>
    %26 = vector.broadcast %25 : vector<1x512xi1> to vector<1x512xi1>
    %27 = arith.xori %23, %26 : vector<1x512xi1>
    %28 = arith.andi %27, %21 : vector<1x512xi1>
    %29 = vector.broadcast %17 : i32 to vector<1x512xi32>
    %30 = arith.addi %19, %29 : vector<1x512xi32>
    %31 = arith.select %28, %30, %19 : vector<1x512xi1>, vector<1x512xi32>
    %c15_i32 = arith.constant 15 : i32
    %32 = vector.broadcast %c15_i32 : i32 to vector<1x512xi32>
    %33 = arith.cmpi slt, %31, %32 : vector<1x512xi32>
    %c0_i32_17 = arith.constant 0 : i32
    %34 = arith.sitofp %c0_i32_17 : i32 to f32
    %35 = vector.shape_cast %33 : vector<1x512xi1> to vector<1x512xi1>
    %36 = vector.broadcast %35 : vector<1x512xi1> to vector<8x512xi1>
    %37 = vector.broadcast %34 : f32 to vector<8x512xf32>
    %38 = arith.select %36, %12, %37 : vector<8x512xi1>, vector<8x512xf32>
    %c0_i32_18 = arith.constant 0 : i32
    %39 = vector.broadcast %c0_i32_18 : i32 to vector<1x512xi32>
    %40 = arith.cmpi sgt, %31, %39 : vector<1x512xi32>
    %c0_i32_19 = arith.constant 0 : i32
    %41 = arith.sitofp %c0_i32_19 : i32 to f32
    %42 = vector.shape_cast %40 : vector<1x512xi1> to vector<1x512xi1>
    %43 = vector.broadcast %42 : vector<1x512xi1> to vector<8x512xi1>
    %44 = vector.broadcast %41 : f32 to vector<8x512xf32>
    %45 = arith.select %43, %12, %44 : vector<8x512xi1>, vector<8x512xf32>
    %cst_20 = arith.constant 0.000000e+00 : f32
    %46 = vector.broadcast %cst_20 : f32 to vector<16x256xf32>
    %47 = vector.extract_strided_slice %38 {offsets = [0, 111], sizes = [8, 256], strides = [1, 1]} : vector<8x512xf32> to vector<8x256xf32>
    %c0_21 = arith.constant 0 : index
    %c0_22 = arith.constant 0 : index
    %c0_23 = arith.constant 0 : index
    %48 = vector.load %arg4[%c0_21, %c0_22, %c0_23] : memref<9x16x8xf32, #tpu.memory_space<vmem>>, vector<1x16x8xf32>
    %49 = vector.shape_cast %48 : vector<1x16x8xf32> to vector<16x8xf32>
    %cst_24 = arith.constant dense<0.000000e+00> : vector<16x256xf32>
    %50 = tpu.matmul %49, %47, %cst_24 {dimension_numbers = #tpu.dot_dimension_numbers<[1], [0], [0], [1], [0, 0, 1, 1], [], []>} : vector<16x8xf32>, vector<8x256xf32>, vector<16x256xf32> -> vector<16x256xf32>
    %51 = arith.addf %46, %50 : vector<16x256xf32>
    %52 = vector.extract_strided_slice %12 {offsets = [0, 112], sizes = [8, 256], strides = [1, 1]} : vector<8x512xf32> to vector<8x256xf32>
    %c1 = arith.constant 1 : index
    %c0_25 = arith.constant 0 : index
    %c0_26 = arith.constant 0 : index
    %53 = vector.load %arg4[%c1, %c0_25, %c0_26] : memref<9x16x8xf32, #tpu.memory_space<vmem>>, vector<1x16x8xf32>
    %54 = vector.shape_cast %53 : vector<1x16x8xf32> to vector<16x8xf32>
    %cst_27 = arith.constant dense<0.000000e+00> : vector<16x256xf32>
    %55 = tpu.matmul %54, %52, %cst_27 {dimension_numbers = #tpu.dot_dimension_numbers<[1], [0], [0], [1], [0, 0, 1, 1], [], []>} : vector<16x8xf32>, vector<8x256xf32>, vector<16x256xf32> -> vector<16x256xf32>
    %56 = arith.addf %51, %55 : vector<16x256xf32>
    %57 = vector.extract_strided_slice %45 {offsets = [0, 113], sizes = [8, 256], strides = [1, 1]} : vector<8x512xf32> to vector<8x256xf32>
    %c2 = arith.constant 2 : index
    %c0_28 = arith.constant 0 : index
    %c0_29 = arith.constant 0 : index
    %58 = vector.load %arg4[%c2, %c0_28, %c0_29] : memref<9x16x8xf32, #tpu.memory_space<vmem>>, vector<1x16x8xf32>
    %59 = vector.shape_cast %58 : vector<1x16x8xf32> to vector<16x8xf32>
    %cst_30 = arith.constant dense<0.000000e+00> : vector<16x256xf32>
    %60 = tpu.matmul %59, %57, %cst_30 {dimension_numbers = #tpu.dot_dimension_numbers<[1], [0], [0], [1], [0, 0, 1, 1], [], []>} : vector<16x8xf32>, vector<8x256xf32>, vector<16x256xf32> -> vector<16x256xf32>
    %61 = arith.addf %56, %60 : vector<16x256xf32>
    %62 = vector.extract_strided_slice %38 {offsets = [0, 127], sizes = [8, 256], strides = [1, 1]} : vector<8x512xf32> to vector<8x256xf32>
    %c3 = arith.constant 3 : index
    %c0_31 = arith.constant 0 : index
    %c0_32 = arith.constant 0 : index
    %63 = vector.load %arg4[%c3, %c0_31, %c0_32] : memref<9x16x8xf32, #tpu.memory_space<vmem>>, vector<1x16x8xf32>
    %64 = vector.shape_cast %63 : vector<1x16x8xf32> to vector<16x8xf32>
    %cst_33 = arith.constant dense<0.000000e+00> : vector<16x256xf32>
    %65 = tpu.matmul %64, %62, %cst_33 {dimension_numbers = #tpu.dot_dimension_numbers<[1], [0], [0], [1], [0, 0, 1, 1], [], []>} : vector<16x8xf32>, vector<8x256xf32>, vector<16x256xf32> -> vector<16x256xf32>
    %66 = arith.addf %61, %65 : vector<16x256xf32>
    %67 = vector.extract_strided_slice %12 {offsets = [0, 128], sizes = [8, 256], strides = [1, 1]} : vector<8x512xf32> to vector<8x256xf32>
    %c4_34 = arith.constant 4 : index
    %c0_35 = arith.constant 0 : index
    %c0_36 = arith.constant 0 : index
    %68 = vector.load %arg4[%c4_34, %c0_35, %c0_36] : memref<9x16x8xf32, #tpu.memory_space<vmem>>, vector<1x16x8xf32>
    %69 = vector.shape_cast %68 : vector<1x16x8xf32> to vector<16x8xf32>
    %cst_37 = arith.constant dense<0.000000e+00> : vector<16x256xf32>
    %70 = tpu.matmul %69, %67, %cst_37 {dimension_numbers = #tpu.dot_dimension_numbers<[1], [0], [0], [1], [0, 0, 1, 1], [], []>} : vector<16x8xf32>, vector<8x256xf32>, vector<16x256xf32> -> vector<16x256xf32>
    %71 = arith.addf %66, %70 : vector<16x256xf32>
    %72 = vector.extract_strided_slice %45 {offsets = [0, 129], sizes = [8, 256], strides = [1, 1]} : vector<8x512xf32> to vector<8x256xf32>
    %c5 = arith.constant 5 : index
    %c0_38 = arith.constant 0 : index
    %c0_39 = arith.constant 0 : index
    %73 = vector.load %arg4[%c5, %c0_38, %c0_39] : memref<9x16x8xf32, #tpu.memory_space<vmem>>, vector<1x16x8xf32>
    %74 = vector.shape_cast %73 : vector<1x16x8xf32> to vector<16x8xf32>
    %cst_40 = arith.constant dense<0.000000e+00> : vector<16x256xf32>
    %75 = tpu.matmul %74, %72, %cst_40 {dimension_numbers = #tpu.dot_dimension_numbers<[1], [0], [0], [1], [0, 0, 1, 1], [], []>} : vector<16x8xf32>, vector<8x256xf32>, vector<16x256xf32> -> vector<16x256xf32>
    %76 = arith.addf %71, %75 : vector<16x256xf32>
    %77 = vector.extract_strided_slice %38 {offsets = [0, 143], sizes = [8, 256], strides = [1, 1]} : vector<8x512xf32> to vector<8x256xf32>
    %c6 = arith.constant 6 : index
    %c0_41 = arith.constant 0 : index
    %c0_42 = arith.constant 0 : index
    %78 = vector.load %arg4[%c6, %c0_41, %c0_42] : memref<9x16x8xf32, #tpu.memory_space<vmem>>, vector<1x16x8xf32>
    %79 = vector.shape_cast %78 : vector<1x16x8xf32> to vector<16x8xf32>
    %cst_43 = arith.constant dense<0.000000e+00> : vector<16x256xf32>
    %80 = tpu.matmul %79, %77, %cst_43 {dimension_numbers = #tpu.dot_dimension_numbers<[1], [0], [0], [1], [0, 0, 1, 1], [], []>} : vector<16x8xf32>, vector<8x256xf32>, vector<16x256xf32> -> vector<16x256xf32>
    %81 = arith.addf %76, %80 : vector<16x256xf32>
    %82 = vector.extract_strided_slice %12 {offsets = [0, 144], sizes = [8, 256], strides = [1, 1]} : vector<8x512xf32> to vector<8x256xf32>
    %c7_44 = arith.constant 7 : index
    %c0_45 = arith.constant 0 : index
    %c0_46 = arith.constant 0 : index
    %83 = vector.load %arg4[%c7_44, %c0_45, %c0_46] : memref<9x16x8xf32, #tpu.memory_space<vmem>>, vector<1x16x8xf32>
    %84 = vector.shape_cast %83 : vector<1x16x8xf32> to vector<16x8xf32>
    %cst_47 = arith.constant dense<0.000000e+00> : vector<16x256xf32>
    %85 = tpu.matmul %84, %82, %cst_47 {dimension_numbers = #tpu.dot_dimension_numbers<[1], [0], [0], [1], [0, 0, 1, 1], [], []>} : vector<16x8xf32>, vector<8x256xf32>, vector<16x256xf32> -> vector<16x256xf32>
    %86 = arith.addf %81, %85 : vector<16x256xf32>
    %87 = vector.extract_strided_slice %45 {offsets = [0, 145], sizes = [8, 256], strides = [1, 1]} : vector<8x512xf32> to vector<8x256xf32>
    %c8 = arith.constant 8 : index
    %c0_48 = arith.constant 0 : index
    %c0_49 = arith.constant 0 : index
    %88 = vector.load %arg4[%c8, %c0_48, %c0_49] : memref<9x16x8xf32, #tpu.memory_space<vmem>>, vector<1x16x8xf32>
    %89 = vector.shape_cast %88 : vector<1x16x8xf32> to vector<16x8xf32>
    %cst_50 = arith.constant dense<0.000000e+00> : vector<16x256xf32>
    %90 = tpu.matmul %89, %87, %cst_50 {dimension_numbers = #tpu.dot_dimension_numbers<[1], [0], [0], [1], [0, 0, 1, 1], [], []>} : vector<16x8xf32>, vector<8x256xf32>, vector<16x256xf32> -> vector<16x256xf32>
    %91 = arith.addf %86, %90 : vector<16x256xf32>
    %c0_51 = arith.constant 0 : index
    %c0_52 = arith.constant 0 : index
    %92 = vector.load %arg5[%c0_51, %c0_52] : memref<16x1xf32, #tpu.memory_space<vmem>>, vector<16x1xf32>
    %93 = vector.broadcast %92 : vector<16x1xf32> to vector<16x256xf32>
    %94 = arith.addf %91, %93 : vector<16x256xf32>
    %c0_53 = arith.constant 0 : index
    %c0_54 = arith.constant 0 : index
    %c0_55 = arith.constant 0 : index
    %95 = vector.load %arg6[%c0_53, %c0_54, %c0_55] : memref<1x16x256xf32, #tpu.memory_space<vmem>>, vector<1x16x256xf32>
    %96 = vector.shape_cast %95 : vector<1x16x256xf32> to vector<16x256xf32>
    %97 = vector.shape_cast %94 : vector<16x256xf32> to vector<1x16x256xf32>
    tpu.vector_store %arg6[%c0_53, %c0_54, %c0_55], %97 {strides = array<i32>} : memref<1x16x256xf32, #tpu.memory_space<vmem>>, vector<1x16x256xf32>,
    return
  }
  func.func @transform_0(%arg0: i32, %arg1: i32) -> (i32, i32, i32) {
    %c0_i32 = arith.constant 0 : i32
    %c0_i32_0 = arith.constant 0 : i32
    %c0_i32_1 = arith.constant 0 : i32
    return %arg0, %c0_i32, %c0_i32_0 : i32, i32, i32
  }
  func.func @transform_1(%arg0: i32, %arg1: i32) -> (i32, i32, i32) {
    %c0_i32 = arith.constant 0 : i32
    %c0_i32_0 = arith.constant 0 : i32
    %c0_i32_1 = arith.constant 0 : i32
    return %arg0, %c0_i32, %c0_i32_0 : i32, i32, i32
  }
  func.func @transform_2(%arg0: i32, %arg1: i32) -> (i32, i32, i32) {
    %c0_i32 = arith.constant 0 : i32
    %c0_i32_0 = arith.constant 0 : i32
    %c0_i32_1 = arith.constant 0 : i32
    %c0_i32_2 = arith.constant 0 : i32
    return %c0_i32, %c0_i32_0, %c0_i32_1 : i32, i32, i32
  }
  func.func @transform_3(%arg0: i32, %arg1: i32) -> (i32, i32) {
    %c0_i32 = arith.constant 0 : i32
    %c0_i32_0 = arith.constant 0 : i32
    %c0_i32_1 = arith.constant 0 : i32
    return %c0_i32, %c0_i32_0 : i32, i32
  }
  func.func @transform_4(%arg0: i32, %arg1: i32) -> (i32, i32, i32) {
    %c0_i32 = arith.constant 0 : i32
    %c0_i32_0 = arith.constant 0 : i32
    return %arg0, %c0_i32, %arg1 : i32, i32, i32
  }
}

</mosaic_0001>

<bundles_post_ra>
// kernel: tpu_custom_call.1
= control target key start
LH: loop header
LB: loop body
LE: loop exit
PB: predicated region body
PF: predicated region fallthrough
CT: control target
= control target key end

     0   :  { %9 = vsyncpa [#allocation4], 0  ;;  %s1625_s0 = inlined_call_operand.vmem [shape: f32[2,4,256], index: 0, kind: input, shape index: {}]   ;;  %s1626_s1 = inlined_call_operand.vmem [shape: f32[2,3,256], index: 1, kind: input, shape index: {}]   ;;  %s1627_s2 = inlined_call_operand.vmem [shape: f32[9,16,8], index: 2, kind: input, shape index: {}]   ;;  %s1628_s3 = inlined_call_operand.vmem [shape: f32[16,1], index: 3, kind: input, shape index: {}]   ;;  %s1629_s4 = inlined_call_operand.hbm [shape: f32[2,16,256], index: 4, kind: output, shape index: {}]  }
   0x1   :  { %11 = vsyncpa [#allocation4 + $0x1], 0  ;;  %s1398_s15 = smov 0   ;;  %s1400_s16 = smov 0  }
   0x2   :  { %s1402_s17 = smov 0   ;;  %s1404_s18 = smov 0  }
   0x3   :  { %s1406_s19 = smov 0   ;;  %s1408_s20 = smov 0  }
   0x4 LB: > { %s1098_s21 = sadd.s32 4294967295, %s1360_s20   ;;  %s1099_s22 = sadd.s32 4294967294, %s1360_s20   ;;  %s1360_s20 = sphi %s1408_s20, %s17_s20   ;;  %s1356_s19 = sphi %s1406_s19, %s1636_s19   ;;  %s1352_s18 = sphi %s1404_s18, %s1635_s18   ;;  %s1348_s17 = sphi %s1402_s17, %s1634_s17   ;;  %s1344_s16 = sphi %s1400_s16, %s1633_s16   ;;  %s1340_s15 = sphi %s1398_s15, %s1632_s15  }
   0x5   : > { %s29_s23 = sadd.s32 1, %s1356_s19  ;;  %s132_s24 = sadd.s32 1, %s1348_s17 }
   0x6   : > { %p31_p0 = scmp.ge.s32.totalorder %s29_s23, 2  ;;  %p142_p1 = scmp.ne.s32.totalorder %s1348_s17, %s1344_s16 }
   0x7   : > { %p143_p2 = scmp.eq.s32.totalorder %s1098_s21, 1  ;;  %p148_p3 = scmp.ne.s32.totalorder %s1344_s16, %s1340_s15 }
   0x8   : > { %s1638_s23 = smov (%p31_p0, %s29_s23), 0  ;;  %p149_p5 = scmp.eq.s32.totalorder %s1099_s22, 1 }
   0x9   : > { %p1438_p4 = por %p143_p2, %p142_p1  ;;  %s127_s26 = ssub.s32 %s1356_s19, %s1638_s23 }
   0xa   : > { %p1102_p6 = scmp.ge.s32.totalorder %s1360_s20, 1  ;;  %p130_p7 = scmp.eq.s32.totalorder %s127_s26, 0 }
   0xb   : > { %p1445_p8 = por %p149_p5, %p148_p3  ;;  %p189_p9 = scmp.lt.s32.totalorder %s1360_s20, 3 }
   0xc   : > { %s1451_s28 = scalar_select %p130_p7, %s1348_s17, %s132_s24  }
   0xd   : > { %p190_p10 = pnand %p1102_p6, %p189_p9 }
   0xe   : > { %p220_p11 = scmp.lt.s32.totalorder (!%p190_p10), %s1352_s18, 1  ;;  %s1363_s11 = smov (!%p190_p10), 16  }
   0xf   : > { %193 = sbr.rel (%p190_p10) target bundleno = 383 (0x17f), region = 36  ;;  %s1364_s12 = smov (!%p190_p10), 17  }
  0x10   : > { %s1365_s13 = smov (!%p190_p10), 15   ;;  %s1366_s14 = smov (!%p190_p10), 1  }
  0x11   : > { %s1367_s21 = smov (!%p190_p10), 127   ;;  %s1368_s22 = smov (!%p190_p10), 113  }
  0x12   : > { %s1369_s24 = smov (!%p190_p10), 112   ;;  %s1370_s26 = smov (!%p190_p10), 111  }
  0x14   : > { %v250_v0 = vlaneseq  ;;  %vm257_vm0 = vcmask 1047424   ;;  %v1362_v1 = vmov 0.0   ;;  %s221_s29 = scalar_select %p220_p11, %s1352_s18, 1  ;;  %vm259_vm4 = vcmask 129024   ;;  %v1112_v50 = vld [vmem:[%s1627_s2 + $0x18] sm:$0xff]  ;;  %v1111_v51 = vld [vmem:[%s1627_s2 + $0x10] sm:$0xff] }
  0x15   : > { %258 = vst.msk [vmem:[#allocation2] sm:$0x7f] %vm257_vm0, %v1362_v1  ;;  %vm366_vm14 = vcmask 130048   ;;  %vm502_vm15 = vcmask 121856   ;;  %vm433_vm0 = vcmask 138240   ;;  %v352_v61 = vld [vmem:[%s1627_s2] sm:$0xff] }
  0x16   : > { %vm252_vm1 = vcmp.lt.s32.totalorder %v250_v0, 512  ;;  %v266_v2 = vand.u32 127, %v250_v0  ;;  %s1168_s30 = sshll.u32 %s221_s29, 3  ;;  %260 = vst.msk [vmem:[#allocation2 + $0x18] sm:$0x7f] %vm259_vm4, %v1362_v1  ;;  %v1121_v62 = vld [vmem:[%s1627_s2 + $0x20] sm:$0xff] }
  0x17   : > { %255 = vst.msk [vmem:[#allocation2 + $0x7] ss:$8 sm:$0xf] %vm252_vm1, %v1362_v1  ;;  %s224_s7 = scalar_lea.vmem %s1625_s0, %s1168_s30  ;;  %s229_s10 = scalar_lea.vmem %s1626_s1, %s1168_s30  ;;  %vm371_vm1 = vcmask 64512   ;;  %vm773_vm4 = vcmask 924672  }
  0x18   : > { %v1108_v3 = vadd.s32 4294967168, %v266_v2  ;;  %v231_v4 = vld [vmem:[%s224_s7] sm:$0xff]  ;;  %v283_v15 = vand.u32 15, %v266_v2  ;;  %v267_v16 = vadd.s32 256, %v266_v2  ;;  %v268_v30 = vadd.s32 384, %v266_v2 }
  0x19   : > { %233 = vst [vmem:[#allocation1] ss:$2 sm:$0xff] %v231_v4  ;;  %v240_v7 = vld [vmem:[%s229_s10] sm:$0x77] }
  0x1a   : > { %v273_v5 = vsub.s32 0, %v1108_v3  ;;  %vm321_vm8 = vcmp.lt.s32.totalorder %v283_v15, 15  ;;  %v1109_v18 = vadd.s32 4294967168, %v267_v16  ;;  %vm337_vm9 = vcmp.gt.s32.totalorder %v283_v15, 0 }
  0x1b   : > { %v1110_v32 = vadd.s32 4294967168, %v268_v30 }
  0x1c   : > { %v276_v6 = vand.u32 15, %v273_v5  ;;  %v290_v26 = vand.u32 15, %v1109_v18 }
  0x1d   : > { %v297_v34 = vand.u32 15, %v1110_v32 }
  0x1e   : > { %v277_v8 = vsub.s32 0, %v276_v6  ;;  %v261_v17 = vld [vmem:[#allocation2] sm:$0xff]  ;;  %vm322_vm10 = vcmp.lt.s32.totalorder %v290_v26, 15  ;;  %vm338_vm11 = vcmp.gt.s32.totalorder %v290_v26, 0  ;;  %v264_v35 = vld [vmem:[#allocation2 + $0x18] sm:$0xff] }
  0x1f   : > { %vm339_vm12 = vcmp.gt.s32.totalorder %v297_v34, 0  ;;  %vm323_vm13 = vcmp.lt.s32.totalorder %v297_v34, 15  ;;  %v353_v6 = vld [vmem:[%s1627_s2 + $0x8] sm:$0xff]  ;;  %v1139_v34 = vld [vmem:[%s1627_s2 + $0x50] sm:$0xff] }
  0x20   : > { %v234_v9 = vld.sshfl [vmem:[#allocation1] sm:$0xff pattern:$0x75316420]  ;;  %v235_v10 = vld.sshfl [vmem:[#allocation1 + $0x8] sm:$0xff pattern:$0x75316420] }
  0x21   : > { %238 = vst [vmem:[#allocation2 + $0x8] sm:$0xf] %v234_v9  ;;  %vm300_vm2 = vcmp.ne.s32.totalorder %v277_v8, 0  ;;  %vm304_vm3 = vcmp.lt.s32.totalorder %v277_v8, 0  ;;  %v312_v11 = vadd.s32 16, %v277_v8  ;;  %v351_v36 = vsel %vm339_vm12, %v264_v35, 0.0 }
  0x22   : > { %243 = vst [vmem:[#allocation1 + $0x1] ss:$2 sm:$0xff] %v240_v7  ;;  %vm308_vm5 = vmand %vm304_vm3, %vm300_vm2  ;;  %v335_v38 = vsel %vm323_vm13, %v264_v35, 0.0  ;;  %vm572_vm2 = vcmask 7168   ;;  %vm702_vm3 = vcmask 1039360   ;;  %v1122_v9 = vld [vmem:[%s1627_s2 + $0x28] sm:$0xff] }
  0x23   : > { %239 = vst [vmem:[#allocation2 + $0x10] sm:$0xf] %v235_v10  ;;  %v316_v14 = vsel %vm308_vm5, %v312_v11, %v277_v8  ;;  %vm914_vm5 = vcmask 908288  }
  0x24   : > { %vm320_vm6 = vcmp.lt.s32.totalorder %v316_v14, 15  ;;  %vm336_vm7 = vcmp.gt.s32.totalorder %v316_v14, 0 }
  0x25   : > { %v332_v19 = vsel %vm320_vm6, %v261_v17, 0.0  ;;  %v348_v20 = vsel %vm336_vm7, %v261_v17, 0.0  ;;  %vm844_vm6 = vcmask 916480  }
  0x29   : > { %v244_v12 = vld.sshfl [vmem:[#allocation1] sm:$0xff pattern:$0x75316420]  ;;  %v245_v13 = vld.sshfl [vmem:[#allocation1 + $0x8] sm:$0xff pattern:$0x75316420] }
  0x2a   : > { %248 = vst [vmem:[#allocation2 + $0x8] sm:$0x70] %v244_v12 }
  0x2b   : > { %249 = vst [vmem:[#allocation2 + $0x10] sm:$0x70] %v245_v13 }
  0x31   : > { %v1461_v21 = vld [vmem:[#allocation2 + $0x8] sm:$0xff] }
  0x32   : > { %v1239_v22 = vpack.i.bf16 %v1461_v21, %v261_v17  ;;  %v333_v23 = vsel %vm321_vm8, %v1461_v21, 0.0  ;;  %v349_v24 = vsel %vm337_vm9, %v1461_v21, 0.0  ;;  %v1467_v28 = vld [vmem:[#allocation2 + $0x10] sm:$0xff]  ;;  %v1127_v17 = vld [vmem:[%s1627_s2 + $0x30] sm:$0xff] }
  0x33   : > { %v1244_v25 = vpack.i.bf16 %v333_v23, %v332_v19  ;;  %v1249_v27 = vpack.i.bf16 %v349_v24, %v348_v20  ;;  %v334_v29 = vsel %vm322_vm10, %v1467_v28, 0.0  ;;  %v350_v31 = vsel %vm338_vm11, %v1467_v28, 0.0  ;;  %v1133_v20 = vld [vmem:[%s1627_s2 + $0x40] sm:$0xff] }
  0x34   : > { %1240 = vrot.lane.b32.xlu0 %v1239_v22, %s1363_s11  ;;  %v1259_v33 = vpack.i.bf16 %v350_v31, %v349_v24  ;;  %v1269_v37 = vpack.i.bf16 %v334_v29, %v333_v23  ;;  %v1264_v39 = vpack.i.bf16 %v1467_v28, %v1461_v21 }
  0x35   : > { %1245 = vrot.lane.b32.xlu1 %v1244_v25, %s1364_s12  ;;  %1250 = vrot.lane.b32.xlu2 %v1249_v27, %s1365_s13 }
  0x3c   : > { %364 = vrot.lane.b32.xlu0 %v1467_v28, %s1363_s11 }
  0x3d   : > { %431 = vrot.lane.b32.xlu1 %v334_v29, %s1364_s12  ;;  %500 = vrot.lane.b32.xlu2 %v350_v31, %s1365_s13  ;;  %s1302_s12 = scalar_lea.hbm %s1629_s4, 64 }
  0x44   : > { %1255 = vrot.lane.b32.xlu0 %v1244_v25, %s1366_s14 }
  0x45   : > { %570 = vrot.lane.b32.xlu1 %v334_v29, %s1366_s14  ;;  %1260 = vrot.lane.b32.xlu2 %v1259_v33, %s1367_s21  ;;  %v1134_v29 = vld [vmem:[%s1627_s2 + $0x48] sm:$0xff]  ;;  %s217_s14 = sand.u32 1, %s1344_s16  }
  0x4c   : > { %700 = vrot.lane.b32.xlu0 %v351_v36, %s1367_s21  ;;  %s1103_s21 = sshll.u32 %s217_s14, 5 }
  0x4d   : > { %1270 = vrot.lane.b32.xlu1 %v1269_v37, %s1368_s22  ;;  %771 = vrot.lane.b32.xlu2 %v335_v38, %s1368_s22  ;;  %v1371_v37 = vmov 0   ;;  %v976_v38 = vld [vmem:[%s1628_s3 + $0x8] sm:$0xff]  ;;  %s219_s22 = scalar_lea.vmem [#allocation3], %s1103_s21 }
  0x4e   : > { %1279 = vset.pattern.permute.xlu1 %v1371_v37  ;;  %1280 = vset.pattern.permute.xlu2 %v1371_v37  ;;  %s1010_s5 = sshll.u32 %s219_s22, 4  ;;  %s1011_s5 = int_to_ptr.vmem [resolvable:$true] %s1010_s5 }
  0x4f   : > { %1281 = vset.pattern.permute.xlu0 %v1371_v37 }
  0x54   : > { %1265 = vrot.lane.b32.xlu0 %v1264_v39, %s1369_s24  ;;  %v1140_v39 = vld [vmem:[%s1627_s2 + $0x58] sm:$0xff] }
  0x55   : > { %842 = vrot.lane.b32.xlu1 %v264_v35, %s1369_s24  ;;  %1275 = vrot.lane.b32.xlu2 %v1259_v33, %s1370_s26  ;;  %v1145_v35 = vld [vmem:[%s1627_s2 + $0x60] sm:$0xff]  ;;  %s1170_s24 = sshll.u32 %s1352_s18, 5  ;;  %s996_s18 = scalar_lea.sflag [#allocation4], %s217_s14 }
  0x56   : > { %s1009_s30 = scalar_lea.hbm %s1629_s4, %s1170_s24 }
  0x57   : > { %s1012_s6 = sshll.u32 %s1009_s30, 4  ;;  %s1013_s6 = int_to_ptr.hbm [resolvable:$true] %s1012_s6 }
  0x58   : > { %s1296_s7 = sshra.s32 %s1013_s6, 4  ;;  %s1297_s7 = int_to_ptr.hbm [resolvable:$true] %s1296_s7 }
  0x59   : > { %s1298_s8 = scalar_lea.hbm %s1297_s7, 32  ;;  %p1303_p1 = scmp.lt.s32.totalorder %s1297_s7, %s1629_s4 }
  0x5a   : > { %p1299_p12 = scmp.ne.s32.totalorder %s1297_s7, %s1298_s8  ;;  %p1304_p2 = scmp.lt.s32.totalorder %s1302_s12, %s1298_s8 }
  0x5c   : > { %912 = vrot.lane.b32.xlu0 %v351_v36, %s1370_s26  ;;  %v975_v36 = vld [vmem:[%s1628_s3] sm:$0xff]  ;;  %p1300_p13 = pnand %p1299_p12, %p1438_p4  ;;  %p1305_p3 = por %p1304_p2, %p1303_p1 }
  0x5d   : > { %979 = vperm.xlu1 %1279, %v975_v36   ;;  %984 = vperm.xlu2 %1280, %v976_v38  }
  0x5e   : > { %p1301_p0 = pneg %p1300_p13 }
  0x60   : > { %p1306_p5 = pnand %p1305_p3, %p1301_p0 }
  0x8f   : > { %v1251_v40 = vpop.permute.xlu2 %1250 }
  0x90   : > { %v1253_v42 = vunpack.i.h.bf16 %v1251_v40  ;;  %v1252_v43 = vunpack.i.l.bf16 %v1251_v40  ;;  %v1146_v40 = vld [vmem:[%s1627_s2 + $0x68] sm:$0xff] }
  0x92   : > { %v503_v53 = vsel %vm502_vm15, %v1252_v43, %v1253_v42  ;;  %v1152_v43 = vld [vmem:[%s1627_s2 + $0x78] sm:$0xff] }
  0x97   : > { %v501_v41 = vpop.permute.xlu2 %500 }
  0x98   : > { %v504_v57 = vsel %vm502_vm15, %v1253_v42, %v501_v41  ;;  %v1151_v41 = vld [vmem:[%s1627_s2 + $0x70] sm:$0xff]  ;;  %v1157_v42 = vld [vmem:[%s1627_s2 + $0x80] sm:$0xff] }
  0x9f   : > { %v1261_v55 = vpop.permute.xlu2 %1260 }
  0xa0   : > { %v1263_v0 = vunpack.i.h.bf16 %v1261_v55  ;;  %v1262_v1 = vunpack.i.l.bf16 %v1261_v55 }
  0xa2   : > { %v703_v10 = vsel %vm702_vm3, %v1262_v1, %v1263_v0 }
  0xa6   : > { %v1241_v44 = vpop.permute.xlu0 %1240 }
  0xa7   : > { %v1243_v45 = vunpack.i.h.bf16 %v1241_v44  ;;  %v1242_v46 = vunpack.i.l.bf16 %v1241_v44  ;;  %v1246_v47 = vpop.permute.xlu1 %1245  ;;  %v772_v63 = vpop.permute.xlu2 %771  ;;  %v1158_v44 = vld [vmem:[%s1627_s2 + $0x88] sm:$0xff] }
  0xa8   : > { %v1248_v48 = vunpack.i.h.bf16 %v1246_v47  ;;  %v1247_v49 = vunpack.i.l.bf16 %v1246_v47 }
  0xa9   : > { %v367_v52 = vsel %vm366_vm14, %v1242_v46, %v1243_v45 }
  0xaa   : > { %393 = vmatpush.msra.mxu0 %v367_v52  ;;  %1171 = vmatpush.msra.mxu2 %v367_v52  ;;  %v434_v54 = vsel %vm433_vm0, %v1247_v49, %v1248_v48 }
  0xab   : > { %1114 = vmatmul.msk.f32.vlgmr.msra.gmra.mxu2 %vm371_vm1, %v1112_v50  ;;  %1113 = vmatmul.msk.f32.vlgmr.msra.gmra.mxu0 %vm371_vm1, %v1111_v51 }
  0xac   : > { %459 = vmatpush.msrb.mxu2 %v434_v54  ;;  %528 = vmatpush.msrb.mxu0 %v503_v53 }
  0xae   : > { %657 = vmatpush.msra.mxu0 %v1461_v21  ;;  %v365_v56 = vpop.permute.xlu0 %364 }
  0xaf   : > { %v432_v58 = vpop.permute.xlu1 %431  ;;  %v368_v59 = vsel %vm366_vm14, %v1243_v45, %v365_v56  ;;  %v1276_v11 = vpop.permute.xlu2 %1275 }
  0xb0   : > { %416 = vmatpush.msra.mxu1 %v368_v59  ;;  %1172 = vmatpush.msra.mxu3 %v368_v59  ;;  %v435_v60 = vsel %vm433_vm0, %v1248_v48, %v432_v58  ;;  %v1278_v15 = vunpack.i.h.bf16 %v1276_v11  ;;  %v1277_v16 = vunpack.i.l.bf16 %v1276_v11 }
  0xb1   : > { %1116 = vmatmul.msk.f32.vlgmr.msra.gmra.mxu3 %vm371_vm1, %v1112_v50  ;;  %1115 = vmatmul.msk.f32.vlgmr.msra.gmra.mxu1 %vm371_vm1, %v1111_v51 }
  0xb2   : > { %551 = vmatpush.msrb.mxu1 %v504_v57  ;;  %482 = vmatpush.msrb.mxu3 %v435_v60  ;;  %v915_v23 = vsel %vm914_vm5, %v1277_v16, %v1278_v15 }
  0xb3   : > { %1117 = vmatmul.msk.f32.vlgmr.msrb.gmra.mxu2 %vm371_vm1, %v352_v61  ;;  %1123 = vmatmul.msk.f32.vlgmr.msrb.gmra.mxu0 %vm371_vm1, %v1121_v62 }
  0xb4   : > { %680 = vmatpush.msra.mxu1 %v1467_v28  ;;  %v1128_v28 = vld [vmem:[%s1627_s2 + $0x38] sm:$0xff] }
  0xb6   : > { %v1256_v2 = vpop.permute.xlu0 %1255 }
  0xb7   : > { %v1258_v3 = vunpack.i.h.bf16 %v1256_v2  ;;  %v1257_v4 = vunpack.i.l.bf16 %v1256_v2  ;;  %v571_v5 = vpop.permute.xlu1 %570 }
  0xb9   : > { %v574_v7 = vsel %vm572_vm2, %v1258_v3, %v571_v5  ;;  %1119 = vmatmul.msk.f32.vlgmr.msrb.gmra.mxu3 %vm371_vm1, %v352_v61  ;;  %v573_v8 = vsel %vm572_vm2, %v1257_v4, %v1258_v3  ;;  %1125 = vmatmul.msk.f32.vlgmr.msrb.gmra.mxu1 %vm371_vm1, %v1121_v62 }
  0xba   : > { %598 = vmatpush.msra.mxu2 %v573_v8  ;;  %621 = vmatpush.msra.mxu3 %v574_v7 }
  0xbb   : > { %1118 = vmatmul.msk.f32.gmra.mxu2 %vm371_vm1, %v353_v6  ;;  %1124 = vmatmul.msk.f32.gmra.mxu0 %vm371_vm1, %v1122_v9 }
  0xbc   : > { %728 = vmatpush.msrb.mxu2 %v703_v10 }
  0xbe   : > { %v701_v12 = vpop.permute.xlu0 %700 }
  0xbf   : > { %v704_v13 = vsel %vm702_vm3, %v1263_v0, %v701_v12  ;;  %v1271_v14 = vpop.permute.xlu1 %1270 }
  0xc0   : > { %751 = vmatpush.msrb.mxu3 %v704_v13  ;;  %v1273_v18 = vunpack.i.h.bf16 %v1271_v14  ;;  %v1272_v19 = vunpack.i.l.bf16 %v1271_v14 }
  0xc1   : > { %1120 = vmatmul.msk.f32.gmra.mxu3 %vm371_vm1, %v353_v6  ;;  %1126 = vmatmul.msk.f32.gmra.mxu1 %vm371_vm1, %v1122_v9 }
  0xc2   : > { %v775_v21 = vsel %vm773_vm4, %v1273_v18, %v772_v63  ;;  %v774_v22 = vsel %vm773_vm4, %v1272_v19, %v1273_v18 }
  0xc3   : > { %1129 = vmatmul.msk.f32.vlgmr.msra.gmra.mxu2 %vm371_vm1, %v1127_v17  ;;  %1135 = vmatmul.msk.f32.vlgmr.msra.gmra.mxu0 %vm371_vm1, %v1133_v20 }
  0xc4   : > { %822 = vmatpush.msrb.mxu1 %v775_v21  ;;  %799 = vmatpush.msrb.mxu0 %v774_v22 }
  0xc6   : > { %v1266_v24 = vpop.permute.xlu0 %1265  ;;  %940 = vmatpush.msra.mxu0 %v915_v23 }
  0xc7   : > { %v1268_v25 = vunpack.i.h.bf16 %v1266_v24  ;;  %v1267_v26 = vunpack.i.l.bf16 %v1266_v24  ;;  %v843_v27 = vpop.permute.xlu1 %842 }
  0xc9   : > { %1131 = vmatmul.msk.f32.vlgmr.msra.gmra.mxu3 %vm371_vm1, %v1127_v17  ;;  %v846_v30 = vsel %vm844_vm6, %v1268_v25, %v843_v27  ;;  %v845_v31 = vsel %vm844_vm6, %v1267_v26, %v1268_v25  ;;  %1137 = vmatmul.msk.f32.vlgmr.msra.gmra.mxu1 %vm371_vm1, %v1133_v20 }
  0xca   : > { %870 = vmatpush.msra.mxu2 %v845_v31  ;;  %893 = vmatpush.msra.mxu3 %v846_v30 }
  0xcb   : > { %1130 = vmatmul.msk.f32.gmra.mxu2 %vm371_vm1, %v1128_v28  ;;  %1136 = vmatmul.msk.f32.gmra.mxu0 %vm371_vm1, %v1134_v29 }
  0xce   : > { %v913_v32 = vpop.permute.xlu0 %912 }
  0xcf   : > { %v916_v33 = vsel %vm914_vm5, %v1278_v15, %v913_v32 }
  0xd0   : > { %963 = vmatpush.msra.mxu1 %v916_v33 }
  0xd1   : > { %1132 = vmatmul.msk.f32.gmra.mxu3 %vm371_vm1, %v1128_v28  ;;  %1138 = vmatmul.msk.f32.gmra.mxu1 %vm371_vm1, %v1134_v29  ;;  %v980_v29 = vpop.permute.xlu1 %979 }
  0xd3   : > { %1141 = vmatmul.msk.f32.vlgmr.msrb.gmra.mxu2 %vm371_vm1, %v1139_v34  ;;  %1147 = vmatmul.msk.f32.vlgmr.msrb.gmra.mxu0 %vm371_vm1, %v1145_v35 }
  0xd9   : > { %1143 = vmatmul.msk.f32.vlgmr.msrb.gmra.mxu3 %vm371_vm1, %v1139_v34  ;;  %1149 = vmatmul.msk.f32.vlgmr.msrb.gmra.mxu1 %vm371_vm1, %v1145_v35 }
  0xdb   : > { %1142 = vmatmul.msk.f32.gmra.mxu2 %vm371_vm1, %v1140_v39  ;;  %1148 = vmatmul.msk.f32.gmra.mxu0 %vm371_vm1, %v1146_v40 }
  0xe1   : > { %1144 = vmatmul.msk.f32.gmra.mxu3 %vm371_vm1, %v1140_v39  ;;  %1150 = vmatmul.msk.f32.gmra.mxu1 %vm371_vm1, %v1146_v40 }
  0xe3   : > { %1153 = vmatmul.msk.f32.vlgmr.msra.gmra.mxu2 %vm371_vm1, %v1151_v41  ;;  %1159 = vmatmul.msk.f32.vlgmr.msra.gmra.mxu0 %vm371_vm1, %v1157_v42 }
  0xe9   : > { %1155 = vmatmul.msk.f32.vlgmr.msra.gmra.mxu3 %vm371_vm1, %v1151_v41  ;;  %1161 = vmatmul.msk.f32.vlgmr.msra.gmra.mxu1 %vm371_vm1, %v1157_v42 }
  0xeb   : > { %1154 = vmatmul.msk.f32.gmra.mxu2 %vm371_vm1, %v1152_v43  ;;  %1160 = vmatmul.msk.f32.gmra.mxu0 %vm371_vm1, %v1158_v44 }
  0xf1   : > { %1156 = vmatmul.msk.f32.gmra.mxu3 %vm371_vm1, %v1152_v43  ;;  %1162 = vmatmul.msk.f32.gmra.mxu1 %vm371_vm1, %v1158_v44 }
 0x128   : > { %v395_v45 = vpop.f32.mrf.mxu0 }
 0x12e   : > { %v398_v46 = vpop.f32.mrf.mxu2  ;;  %v418_v47 = vpop.f32.mrf.mxu1 }
 0x130   : > { %v530_v48 = vpop.f32.mrf.mxu0 }
 0x134   : > { %v421_v49 = vpop.f32.mrf.mxu3 }
 0x136   : > { %v461_v50 = vpop.f32.mrf.mxu2  ;;  %v553_v51 = vpop.f32.mrf.mxu1 }
 0x137   : > { %v462_v2 = vadd.f32 %v461_v50, %v395_v45  ;;  %v985_v45 = vpop.permute.xlu2 %984 }
 0x138   : > { %v533_v52 = vpop.f32.mrf.mxu0 }
 0x139   : > { %v559_v5 = vadd.f32 %v530_v48, %v462_v2 }
 0x13c   : > { %v484_v53 = vpop.f32.mrf.mxu3 }
 0x13d   : > { %v485_v7 = vadd.f32 %v484_v53, %v418_v47 }
 0x13e   : > { %v464_v54 = vpop.f32.mrf.mxu2  ;;  %v556_v55 = vpop.f32.mrf.mxu1 }
 0x13f   : > { %v465_v10 = vadd.f32 %v464_v54, %v398_v46  ;;  %v560_v12 = vadd.f32 %v553_v51, %v485_v7 }
 0x140   : > { %v659_v56 = vpop.f32.mrf.mxu0 }
 0x141   : > { %v561_v15 = vadd.f32 %v533_v52, %v465_v10 }
 0x144   : > { %v487_v57 = vpop.f32.mrf.mxu3 }
 0x145   : > { %v488_v18 = vadd.f32 %v487_v57, %v421_v49 }
 0x146   : > { %v600_v58 = vpop.f32.mrf.mxu2  ;;  %v682_v59 = vpop.f32.mrf.mxu1 }
 0x147   : > { %v629_v8 = vadd.f32 %v600_v58, %v559_v5  ;;  %v562_v25 = vadd.f32 %v556_v55, %v488_v18 }
 0x148   : > { %v662_v60 = vpop.f32.mrf.mxu0 }
 0x149   : > { %v688_v13 = vadd.f32 %v659_v56, %v629_v8 }
 0x14c   : > { %v623_v61 = vpop.f32.mrf.mxu3 }
 0x14d   : > { %v630_v16 = vadd.f32 %v623_v61, %v560_v12 }
 0x14e   : > { %v603_v62 = vpop.f32.mrf.mxu2  ;;  %v685_v63 = vpop.f32.mrf.mxu1 }
 0x14f   : > { %v631_v19 = vadd.f32 %v603_v62, %v561_v15  ;;  %v689_v22 = vadd.f32 %v682_v59, %v630_v16 }
 0x150   : > { %v801_v0 = vpop.f32.mrf.mxu0 }
 0x151   : > { %v690_v26 = vadd.f32 %v662_v60, %v631_v19 }
 0x154   : > { %v626_v1 = vpop.f32.mrf.mxu3 }
 0x155   : > { %v632_v30 = vadd.f32 %v626_v1, %v562_v25 }
 0x156   : > { %v730_v3 = vpop.f32.mrf.mxu2  ;;  %v824_v4 = vpop.f32.mrf.mxu1 }
 0x157   : > { %v759_v17 = vadd.f32 %v730_v3, %v688_v13  ;;  %v691_v37 = vadd.f32 %v685_v63, %v632_v30 }
 0x158   : > { %v804_v6 = vpop.f32.mrf.mxu0 }
 0x159   : > { %v830_v23 = vadd.f32 %v801_v0, %v759_v17 }
 0x15c   : > { %v753_v9 = vpop.f32.mrf.mxu3 }
 0x15d   : > { %v760_v27 = vadd.f32 %v753_v9, %v689_v22 }
 0x15e   : > { %v733_v11 = vpop.f32.mrf.mxu2  ;;  %v827_v14 = vpop.f32.mrf.mxu1 }
 0x15f   : > { %v761_v31 = vadd.f32 %v733_v11, %v690_v26  ;;  %v831_v34 = vadd.f32 %v824_v4, %v760_v27 }
 0x160   : > { %v942_v21 = vpop.f32.mrf.mxu0 }
 0x161   : > { %v832_v38 = vadd.f32 %v804_v6, %v761_v31 }
 0x164   : > { %v756_v20 = vpop.f32.mrf.mxu3 }
 0x165   : > { %v762_v42 = vadd.f32 %v756_v20, %v691_v37 }
 0x166   : > { %v872_v24 = vpop.f32.mrf.mxu2  ;;  %v965_v33 = vpop.f32.mrf.mxu1 }
 0x167   : > { %v901_v28 = vadd.f32 %v872_v24, %v830_v23  ;;  %v833_v48 = vadd.f32 %v827_v14, %v762_v42 }
 0x168   : > { %v945_v41 = vpop.f32.mrf.mxu0 }
 0x169   : > { %v971_v32 = vadd.f32 %v942_v21, %v901_v28 }
 0x16b   : > { %v987_v35 = vadd.f32 %v980_v29, %v971_v32 }
 0x16c   : > { %v895_v36 = vpop.f32.mrf.mxu3 }
 0x16d   : > { %991 = vst [vmem:[%s219_s22] sm:$0xff] %v987_v35  ;;  %v902_v39 = vadd.f32 %v895_v36, %v831_v34 }
 0x16e   : > { %v875_v40 = vpop.f32.mrf.mxu2  ;;  %v968_v51 = vpop.f32.mrf.mxu1 }
 0x16f   : > { %v903_v43 = vadd.f32 %v875_v40, %v832_v38  ;;  %v972_v44 = vadd.f32 %v965_v33, %v902_v39 }
 0x171   : > { %v988_v46 = vadd.f32 %v980_v29, %v972_v44  ;;  %v973_v47 = vadd.f32 %v945_v41, %v903_v43 }
 0x173   : > { %992 = vst [vmem:[%s219_s22 + $0x8] sm:$0xff] %v988_v46  ;;  %v989_v49 = vadd.f32 %v985_v45, %v973_v47 }
 0x174   : > { %v898_v50 = vpop.f32.mrf.mxu3 }
 0x175   : > { %993 = vst [vmem:[%s219_s22 + $0x10] sm:$0xff] %v989_v49  ;;  %v904_v52 = vadd.f32 %v898_v50, %v833_v48 }
 0x177   : > { %v974_v53 = vadd.f32 %v968_v51, %v904_v52 }
 0x179   : > { %v990_v54 = vadd.f32 %v985_v45, %v974_v53 }
 0x17b   : > { %994 = vst [vmem:[%s219_s22 + $0x18] sm:$0xff] %v990_v54 }
 0x17c   : > { %1309 = shalt.err (!%p1306_p5)
}
 0x17d   : > { %s1372_s14 = smov 256  }
 0x17e   : > { %1173 = dma.vmem_to_hbm [thread:$0]  (%p1438_p4), %s1011_s5, 512, %s1013_s6, %s996_s18, %s1372_s14, %s1372_s14, %s1363_s11  }
 0x17f PF: > { %p1179_p6 = scmp.ge.s32.totalorder %s1360_s20, 2  ;;  %s1027_s22 = sand.u32 1, %s1340_s15  }
 0x180   : > { %s1028_s24 = scalar_lea.sflag [#allocation4], %s1027_s22 }
 0x181   : > { %p1176_p7 = pnand %p1179_p6, %p1445_p8 }
 0x183   : > { %p1177_p9 = pneg %p1176_p7 }
 0x185   : > { %1335 = dma.done.wait (%p1177_p9), %s1028_s24, 512  }
 0x186   : > { %1337 = vsyncadd (%p1177_p9), %s1028_s24, 4294966784  ;;  %s17_s20 = sadd.s32 1, %s1360_s20   ;;  %s1632_s15 = smov %s1344_s16 }
 0x187   : > { %p14_p10 = scmp.ge.s32.totalorder %s17_s20, 4   ;;  %s1633_s16 = smov %s1348_s17 }
 0x188   : > { %s1634_s17 = smov %s1451_s28  ;;  %s1635_s18 = smov %s1356_s19 }
 0x189   : > { %s1636_s19 = smov %s1638_s23  ;;  %16 = sbr.rel (!%p14_p10) target bundleno = 4 (0x4), region = 84 }
 0x18e   :  { %1034 = vsyncpa [#allocation4], 1 }
 0x18f   :  { %1036 = vsyncpa [#allocation4 + $0x1], 1 }

</bundles_post_ra>
